<compile_context>
chip_gen: v7x
topology: tpu7x:2x2x1
jax: 0.10.0
libtpu: 0.0.40
codegen_flags: <defaults>
</compile_context>

<pallas_src>
import math

import jax
import jax.numpy as jnp
from jax.experimental import pallas as pl
from jax.experimental.pallas import tpu as pltpu


_VMEM_BUDGET = 36 * 1024 * 1024        # target working set (leaves headroom under limit)
_VMEM_LIMIT = 48 * 1024 * 1024         # > v5e's 16 MiB default scoped, < v7x's 64 MiB physical
_XW_RESIDENT_BYTES = 4 * 1024 * 1024   # keep xw fully resident below this (single-copy) size


def _round_up(x: int, m: int) -> int:
    return ((x + m - 1) // m) * m


def normalized_adj(adj: jnp.ndarray) -> jnp.ndarray:
    """Dense JAX equivalent of the PyTorch sparse normalized_adj: D^-1/2 (A+I) D^-1/2.

    Uses broadcasted row/col scaling (O(N^2)) instead of two dense N^3 matmuls.
    """
    n = adj.shape[0]
    adj = adj + jnp.eye(n, dtype=adj.dtype)
    deg = jnp.sum(adj, axis=1)
    d_inv_sqrt = jnp.power(deg, -0.5)
    return adj * d_inv_sqrt[:, None] * d_inv_sqrt[None, :]


def _best_tile(n_aligned: int, cap: int) -> int:
    """Largest multiple-of-256 tile <= cap that minimizes the padded extent of n_aligned."""
    if n_aligned <= 256:
        return n_aligned
    best_t, best_pad = 256, None
    t = 256
    while t <= cap:
        pad = _round_up(n_aligned, t)
        if best_pad is None or pad < best_pad or (pad == best_pad and t > best_t):
            best_t, best_pad = t, pad
        t += 256
    return best_t


def _choose_config(n: int, fout: int, tm: int | None = None, tk: int | None = None):
    """Pick (tm, tk, fp, np_r, np_c, xw_resident) under the VMEM budget."""
    fp = max(128, _round_up(fout, 128))
    n128 = _round_up(n, 128)
    if tm is None:
        tm = _best_tile(n128, 2048)
    if tk is None:
        tk = _best_tile(n128, 1024)
    assert tm % 128 == 0 and tk % 128 == 0, "tile sizes must be multiples of 128"

    def _usage(tm_, tk_):
        np_c_ = _round_up(n, tk_)
        resident = np_c_ * fp * 2 <= _XW_RESIDENT_BYTES
        adj_b = 2 * tm_ * tk_ * 2                      # bf16 adj tile, double-buffered
        out_b = 2 * tm_ * fp * 4                       # f32 output/accumulator tile
        xw_b = 2 * (np_c_ * fp * 2 if resident else tk_ * fp * 2)
        return adj_b + out_b + xw_b + 2 * fp * 4

    # Shrink tiles if the configuration would not fit the VMEM budget (rare: huge fout).
    while _usage(tm, tk) > _VMEM_BUDGET and max(tm, tk) > 256:
        if tm >= tk and tm > 256:
            tm = max(256, tm // 2)
        else:
            tk = max(256, tk // 2)

    np_r = _round_up(n, tm)
    np_c = _round_up(n, tk)
    xw_resident = np_c * fp * 2 <= _XW_RESIDENT_BYTES
    return tm, tk, fp, np_r, np_c, xw_resident


def _make_sgc_kernel(tk: int, xw_resident: bool):
    """Grid = (row_tiles, reduction_tiles). Accumulates directly into the resident o_ref."""

    def kernel(adj_ref, xw_ref, b_ref, o_ref):
        k = pl.program_id(1)

        @pl.when(k == 0)
        def _init():
            o_ref[...] = jnp.zeros_like(o_ref)

        if xw_resident:
            # Whole (np_c, fp) xw lives in VMEM (DMA'd once); take the k-th tk-row slab.
            xw_tile = xw_ref[pl.ds(pl.multiple_of(k * tk, tk), tk), :]
        else:
            xw_tile = xw_ref[...]

        # bf16 x bf16 -> f32 accumulate on the MXU. Single matmul in the hot loop.
        o_ref[...] += jnp.dot(adj_ref[...], xw_tile,
                              preferred_element_type=jnp.float32)

        @pl.when(k == pl.num_programs(1) - 1)
        def _finalize():
            # Bias added once, in the epilogue (kept out of the reduction loop).
            o_ref[...] += b_ref[...]

    return kernel


def sgc_forward(adj_p: jnp.ndarray, x: jnp.ndarray, w: jnp.ndarray, b: jnp.ndarray,
                *, n: int, tm: int, tk: int, fp: int, xw_resident: bool) -> jnp.ndarray:
    """adj_p: pre-padded bf16 (np_r, np_c); x: (n, Fin) f32; w: (Fout, Fin); b: (Fout,)."""
    fout = w.shape[0]
    np_r, np_c = adj_p.shape

    # --- Reassociation: tiny dense projection done once per call (wrapper glue). ---
    xw = jnp.dot(x.astype(jnp.float32), w.astype(jnp.float32).T)   # (n, Fout) f32

    # --- Lane-dense feature padding of the small per-call operands only. ---
    if (np_c, fp) == (n, fout):
        xw_p = xw.astype(jnp.bfloat16)
    else:
        xw_p = jnp.zeros((np_c, fp), jnp.bfloat16).at[:n, :fout].set(
            xw.astype(jnp.bfloat16))
    b_p = jnp.zeros((1, fp), jnp.float32).at[0, :fout].set(b.astype(jnp.float32))

    grid = (np_r // tm, np_c // tk)

    xw_bytes = np_c * fp * 2 if xw_resident else grid[0] * np_c * fp * 2
    cost = pl.CostEstimate(
        flops=2 * np_r * np_c * fp,
        transcendentals=0,
        bytes_accessed=np_r * np_c * 2 + xw_bytes + fp * 4 + np_r * fp * 4,
    )

    if xw_resident:
        xw_spec = pl.BlockSpec((np_c, fp), lambda i, k: (0, 0))   # DMA'd once, resident
    else:
        xw_spec = pl.BlockSpec((tk, fp), lambda i, k: (k, 0))     # streamed per k step

    out_p = pl.pallas_call(
        _make_sgc_kernel(tk, xw_resident),
        out_shape=jax.ShapeDtypeStruct((np_r, fp), jnp.float32),
        grid_spec=pltpu.PrefetchScalarGridSpec(
            num_scalar_prefetch=0,
            grid=grid,
            in_specs=[
                # adj tiles stream over both grid axes (the dominant HBM traffic).
                pl.BlockSpec((tm, tk), lambda i, k: (i, k)),
                xw_spec,
                # bias: constant index_map -> DMA'd once, resident.
                pl.BlockSpec((1, fp), lambda i, k: (0, 0)),
            ],
            out_specs=pl.BlockSpec((tm, fp), lambda i, k: (i, 0)),
        ),
        compiler_params=pltpu.CompilerParams(
            dimension_semantics=("parallel", "arbitrary"),
            vmem_limit_bytes=_VMEM_LIMIT,
        ),
        cost_estimate=cost,
    )(adj_p, xw_p, b_p)

    return out_p[:n, :fout]


class SGC:
    """JAX/Pallas counterpart of the PyTorch SGC module."""

    def __init__(self, in_features, out_features, adj, k, bias=True, key=None,
                 tm=None, tk=None):
        self.in_features = in_features
        self.out_features = out_features
        n = adj.shape[0]
        self.n = n

        # NOTE: PyTorch sparse_tensor.pow(k) is an ELEMENTWISE power of the normalized
        # adjacency values, NOT a matrix power — replicated exactly here (intentional).
        adj_nk = jnp.power(normalized_adj(adj.astype(jnp.float32)), k)

        (self.tm, self.tk, self.fp, np_r, np_c,
         self.xw_resident) = _choose_config(n, out_features, tm=tm, tk=tk)

        # One-time pad + bf16 cast of the STATIC adjacency (kept out of the per-call
        # path per the perf review); skipped entirely when already tile-aligned.
        # bf16 halves the dominant N^2 HBM stream and is a native MXU input.
        if (np_r, np_c) == (n, n):
            self.adj_p = adj_nk.astype(jnp.bfloat16)
        else:
            self.adj_p = (jnp.zeros((np_r, np_c), jnp.bfloat16)
                          .at[:n, :n].set(adj_nk.astype(jnp.bfloat16)))

        if key is None:
            key = jax.random.PRNGKey(0)
        kw, kb = jax.random.split(key)
        # Deterministic init matching nn.Linear's uniform(-1/sqrt(fan_in), +1/sqrt(fan_in)).
        bound = 1.0 / math.sqrt(in_features)
        self.W = jax.random.uniform(
            kw, (out_features, in_features), jnp.float32, -bound, bound)
        if bias:
            self.b = jax.random.uniform(
                kb, (out_features,), jnp.float32, -bound, bound)
        else:
            self.b = jnp.zeros((out_features,), jnp.float32)

    def __call__(self, x):
        return sgc_forward(self.adj_p, x, self.W, self.b,
                           n=self.n, tm=self.tm, tk=self.tk, fp=self.fp,
                           xw_resident=self.xw_resident)


if __name__ == "__main__":
    key = jax.random.PRNGKey(0)
    k_adj, k_x, k_params = jax.random.split(key, 3)

    N = 512          # number of graph nodes (small, but exercises a real 2x2 grid)
    IN_F = 16        # in_features
    OUT_F = 64       # out_features (padded to 128 lanes inside the wrapper)
    K = 2            # SGC exponent (elementwise pow, per PyTorch sparse semantics)

    # Symmetric 0/1 adjacency without self-loops.
    rand = jax.random.uniform(k_adj, (N, N))
    adj_dense = (rand + rand.T > 1.0).astype(jnp.float32)
    adj_dense = adj_dense * (1.0 - jnp.eye(N, dtype=jnp.float32))

    x = jax.random.normal(k_x, (N, IN_F), dtype=jnp.float32)

    # tm=tk=256 -> grid (2, 2): exercises init/finalize across the reduction axis, the
    # parallel row axis, and the resident-xw in-kernel pl.ds slicing, while keeping
    # MXU-friendly multiples of 256 (v6e/v7x feedback).
    model = SGC(IN_F, OUT_F, adj_dense, K, bias=True, key=k_params, tm=256, tk=256)

    out = jax.block_until_ready(model(x))

    # Pure-JAX reference using the exact bf16-quantized operands the kernel consumes
    # (bf16 products are exact in f32, so only accumulation order/precision differs).
    adj_f32 = model.adj_p[:N, :N].astype(jnp.float32)
    xw_q = (x @ model.W.T).astype(jnp.bfloat16).astype(jnp.float32)
    ref = jnp.dot(adj_f32, xw_q, precision=jax.lax.Precision.HIGHEST) + model.b

    assert out.shape == (N, OUT_F)
    max_err = jnp.max(jnp.abs(out - ref))
    assert jnp.allclose(out, ref, atol=2e-3, rtol=2e-3), f"mismatch vs reference: {max_err}"

    print("KERNEL_OK")
</pallas_src>

<mosaic_0001>
module attributes {stable_mosaic.version = 11 : i64} {
  func.func @kernel(%arg0: i32, %arg1: i32, %arg2: memref<256x256xbf16, #tpu.memory_space<vmem>>, %arg3: memref<512x128xbf16, #tpu.memory_space<vmem>>, %arg4: memref<1x128xf32, #tpu.memory_space<vmem>>, %arg5: memref<256x128xf32, #tpu.memory_space<vmem>>) attributes {dimension_semantics = [#tpu.dimension_semantics<parallel>, #tpu.dimension_semantics<arbitrary>], iteration_bounds = array<i64: 2, 2>, scalar_prefetch = 0 : i64, scratch_operands = 0 : i64, tpu.core_type = #tpu.core_type<tc>, window_params = [{transform_indices = @transform_0, window_bounds = array<i64: 256, 256>}, {pipeline_mode = #tpu.pipeline_mode<synchronous>, transform_indices = @transform_1, window_bounds = array<i64: 512, 128>}, {pipeline_mode = #tpu.pipeline_mode<synchronous>, transform_indices = @transform_2, window_bounds = array<i64: 1, 128>}, {transform_indices = @transform_3, window_bounds = array<i64: 256, 128>}]} {
    %c0_i32 = arith.constant 0 : i32
    %0 = arith.cmpi eq, %arg1, %c0_i32 : i32
    %1 = arith.extui %0 : i1 to i32
    %c0_i32_0 = arith.constant 0 : i32
    %2 = arith.cmpi ne, %1, %c0_i32_0 : i32
    scf.if %2 {
      %cst_8 = arith.constant 0.000000e+00 : f32
      %15 = vector.broadcast %cst_8 : f32 to vector<256x128xf32>
      %c0_9 = arith.constant 0 : index
      %c0_10 = arith.constant 0 : index
      %16 = vector.load %arg5[%c0_9, %c0_10] : memref<256x128xf32, #tpu.memory_space<vmem>>, vector<256x128xf32>
      tpu.vector_store %arg5[%c0_9, %c0_10], %15 {strides = array<i32>} : memref<256x128xf32, #tpu.memory_space<vmem>>, vector<256x128xf32>,
    } else {
    }
    %c256_i32 = arith.constant 256 : i32
    %3 = arith.muli %arg1, %c256_i32 : i32
    %4 = tpu.assume_multiple %3, 256 : i32
    %5 = arith.index_cast %4 : i32 to index
    %c0 = arith.constant 0 : index
    %6 = vector.load %arg3[%5, %c0] : memref<512x128xbf16, #tpu.memory_space<vmem>>, vector<256x128xbf16>
    %c0_1 = arith.constant 0 : index
    %c0_2 = arith.constant 0 : index
    %7 = vector.load %arg5[%c0_1, %c0_2] : memref<256x128xf32, #tpu.memory_space<vmem>>, vector<256x128xf32>
    %c0_3 = arith.constant 0 : index
    %c0_4 = arith.constant 0 : index
    %8 = vector.load %arg2[%c0_3, %c0_4] : memref<256x256xbf16, #tpu.memory_space<vmem>>, vector<256x256xbf16>
    %cst = arith.constant dense<0.000000e+00> : vector<256x128xf32>
    %9 = tpu.matmul %8, %6, %cst {dimension_numbers = #tpu.dot_dimension_numbers<[1], [0], [0], [1], [0, 0, 1, 1], [], []>} : vector<256x256xbf16>, vector<256x128xbf16>, vector<256x128xf32> -> vector<256x128xf32>
    %10 = arith.addf %7, %9 : vector<256x128xf32>
    %c0_5 = arith.constant 0 : index
    %c0_6 = arith.constant 0 : index
    %11 = vector.load %arg5[%c0_5, %c0_6] : memref<256x128xf32, #tpu.memory_space<vmem>>, vector<256x128xf32>
    tpu.vector_store %arg5[%c0_5, %c0_6], %10 {strides = array<i32>} : memref<256x128xf32, #tpu.memory_space<vmem>>, vector<256x128xf32>,
    %c1_i32 = arith.constant 1 : i32
    %12 = arith.cmpi eq, %arg1, %c1_i32 : i32
    %13 = arith.extui %12 : i1 to i32
    %c0_i32_7 = arith.constant 0 : i32
    %14 = arith.cmpi ne, %13, %c0_i32_7 : i32
    scf.if %14 {
      %c0_8 = arith.constant 0 : index
      %c0_9 = arith.constant 0 : index
      %15 = vector.load %arg5[%c0_8, %c0_9] : memref<256x128xf32, #tpu.memory_space<vmem>>, vector<256x128xf32>
      %c0_10 = arith.constant 0 : index
      %c0_11 = arith.constant 0 : index
      %16 = vector.load %arg4[%c0_10, %c0_11] : memref<1x128xf32, #tpu.memory_space<vmem>>, vector<1x128xf32>
      %17 = vector.broadcast %16 : vector<1x128xf32> to vector<256x128xf32>
      %18 = arith.addf %15, %17 : vector<256x128xf32>
      %c0_12 = arith.constant 0 : index
      %c0_13 = arith.constant 0 : index
      %19 = vector.load %arg5[%c0_12, %c0_13] : memref<256x128xf32, #tpu.memory_space<vmem>>, vector<256x128xf32>
      tpu.vector_store %arg5[%c0_12, %c0_13], %18 {strides = array<i32>} : memref<256x128xf32, #tpu.memory_space<vmem>>, vector<256x128xf32>,
    } else {
    }
    return
  }
  func.func @transform_0(%arg0: i32, %arg1: i32) -> (i32, i32) {
    %c0_i32 = arith.constant 0 : i32
    return %arg0, %arg1 : i32, i32
  }
  func.func @transform_1(%arg0: i32, %arg1: i32) -> (i32, i32) {
    %c0_i32 = arith.constant 0 : i32
    %c0_i32_0 = arith.constant 0 : i32
    %c0_i32_1 = arith.constant 0 : i32
    return %c0_i32, %c0_i32_0 : i32, i32
  }
  func.func @transform_2(%arg0: i32, %arg1: i32) -> (i32, i32) {
    %c0_i32 = arith.constant 0 : i32
    %c0_i32_0 = arith.constant 0 : i32
    %c0_i32_1 = arith.constant 0 : i32
    return %c0_i32, %c0_i32_0 : i32, i32
  }
  func.func @transform_3(%arg0: i32, %arg1: i32) -> (i32, i32) {
    %c0_i32 = arith.constant 0 : i32
    %c0_i32_0 = arith.constant 0 : i32
    return %arg0, %c0_i32 : i32, i32
  }
}

</mosaic_0001>

<bundles_post_ra>
// kernel: tpu_custom_call.1
= control target key start
LH: loop header
LB: loop body
LE: loop exit
PB: predicated region body
PF: predicated region fallthrough
CT: control target
= control target key end

     0   :  { %s2190_s0 = inlined_call_operand.hbm [shape: bf16[512,512], index: 0, kind: input, shape index: {}]   ;;  %s2191_s1 = inlined_call_operand.hbm [shape: bf16[512,128], index: 1, kind: input, shape index: {}]   ;;  %s2192_s2 = inlined_call_operand.vmem [shape: f32[1,128], index: 2, kind: input, shape index: {}]   ;;  %s2193_s3 = inlined_call_operand.hbm [shape: f32[512,128], index: 3, kind: output, shape index: {}]  }
   0x1   :  { %2205 = sst [smem:[#allocation16_spill]] %s2191_s1 }
   0x2   :  { %8 = vsyncpa [#allocation3], 0 }
   0x3   :  { %10 = vsyncpa [#allocation3 + $0x1], 0 }
   0x4   :  { %11 = vsyncpa [#allocation6], 0 }
   0x5   :  { %12 = vsyncpa [#allocation4], 0 }
   0x6   :  { %14 = vsyncpa [#allocation4 + $0x1], 0  ;;  %s1667_s12 = smov 0   ;;  %s1669_s13 = smov 0  }
   0x7   :  { %s1671_s14 = smov 0   ;;  %s1673_s15 = smov 0  }
   0x8   :  { %s1675_s16 = smov 0   ;;  %s1677_s17 = smov 0  }
   0x9   :  { %s1679_s18 = smov 0   ;;  %s1681_s19 = smov 0  }
   0xa   :  { %s1683_s20 = smov 0   ;;  %s1685_s21 = smov 0  }
   0xb   :  { %s1687_s22 = smov 0  }
   0xc LB: > { %2206 = sst [smem:[#allocation11_spill]] %s1594_s12  ;;  %s1063_s23 = sadd.s32 4294967295, %s1634_s22   ;;  %s1634_s22 = sphi %s1687_s22, %s20_s22   ;;  %s1630_s21 = sphi %s1685_s21, %s2240_s21   ;;  %s1626_s20 = sphi %s1683_s20, %s2231_s20   ;;  %s1622_s19 = sphi %s1681_s19, %s2239_s19   ;;  %s1618_s18 = sphi %s1679_s18, %s2230_s18   ;;  %s1614_s17 = sphi %s1677_s17, %s2238_s17   ;;  %s1610_s16 = sphi %s1675_s16, %s2237_s16   ;;  %s1606_s15 = sphi %s1673_s15, %s2236_s15   ;;  %s1602_s14 = sphi %s1671_s14, %s2235_s14   ;;  %s1598_s13 = sphi %s1669_s13, %s2234_s13   ;;  %s1594_s12 = sphi %s1667_s12, %s2233_s12  }
   0xd   : > { %2207 = sst [smem:[#allocation12_spill]] %s1626_s20  ;;  %s1064_s24 = sadd.s32 4294967294, %s1634_s22  }
   0xe   : > { %p48_p0 = scmp.ne.s32.totalorder %s1614_s17, %s1610_s16  ;;  %p49_p1 = scmp.eq.s32.totalorder %s1634_s22, 0 }
   0xf   : > { %p54_p2 = scmp.ne.s32.totalorder %s1610_s16, %s1606_s15  ;;  %p1727_p3 = scmp.eq.s32.totalorder %s1063_s23, 0 }
  0x10   : > { %p1732_p4 = por %p49_p1, %p48_p0  ;;  %p119_p5 = scmp.ne.s32.totalorder %s1602_s14, %s1598_s13 }
  0x11   : > { %s2208_s26 = scalar_select %p1727_p3, 1, 0 }
  0x12   : > { %p1740_p6 = por %p1727_p3, %p54_p2  ;;  %p120_p7 = scmp.eq.s32.totalorder %s1063_s23, 3 }
  0x13   : > { %p125_p8 = scmp.ne.s32.totalorder %s1598_s13, %s1594_s12  ;;  %p126_p9 = scmp.eq.s32.totalorder %s1064_s24, 3 }
  0x14   : > { %s2210_s29 = scalar_select %p1740_p6, 1, 0 }
  0x15   : > { %p1746_p10 = por %p120_p7, %p119_p5  ;;  %p1065_p11 = scmp.ge.s32.totalorder %s1634_s22, 1 }
  0x16   : > { %p1751_p12 = por %p126_p9, %p125_p8  ;;  %p133_p13 = scmp.lt.s32.totalorder %s1634_s22, 5 }
  0x17   : > { %s2211_s30 = scalar_select %p1746_p10, 1, 0 }
  0x18   : > { %s2212_s4 = scalar_select %p1751_p12, 1, 0 }
  0x19   : > { %p1756_p0 = pnand %p1065_p11, %p133_p13  ;;  %s1636_s6 = smov [#allocation5]  }
  0x1a   : > { %2213 = sst [smem:[#allocation13_spill]] %s2212_s4  ;;  %s145_s7 = sshll.u32 %s1636_s6, 4  ;;  %s146_s7 = int_to_ptr.vmem [resolvable:$true] %s145_s7 }
  0x1b   : > { %s2214_s5 = scalar_select %p1756_p0, 1, 0 }
  0x1c   : > { %p1273_p1 = pneg %p1756_p0  ;;  %p1286_p2 = scmp.lt.s32.totalorder %s1634_s22, 4 }
  0x1d   : > { %s2217_s1 = sld [smem:[#allocation16_spill]] }
  0x1e   : > { %p1765_p5 = pnand %p1273_p1, %p1727_p3  ;;  %p1771_p7 = pnand %p1286_p2, %p1732_p4 }
  0x20   : > { %s2216_s9 = scalar_select %p1771_p7, 1, 0 }
  0x21   : > { %p1452_p9 = pneg %p1765_p5 }
  0x23   : > { %s1450_s15 = scalar_lea.hbm %s2217_s1, 4096 }
  0x24   : > { %p1451_p8 = scmp.ne.s32.totalorder %s2217_s1, %s1450_s15  ;;  %p1457_p1 = scmp.lt.u32.totalorder %s1450_s15, %s2217_s1 }
  0x26   : > { %p1453_p11 = pnand %p1452_p9, %p1451_p8 }
  0x28   : > { %p1454_p13 = pneg %p1453_p11 }
  0x2a   : > { %p1459_p4 = pnand %p1457_p1, %p1454_p13 }
  0x2c   : > { %1462 = shalt.err (!%p1459_p4)
}
  0x2d   : > { %s1463_s28 = scalar_lea.vmem %s146_s7, 4096  ;;  %p1471_p3 = scmp.lt.s32.totalorder %s146_s7, %s146_s7 }
  0x2e   : > { %p1464_p2 = scmp.ne.s32.totalorder %s146_s7, %s1463_s28  ;;  %p1472_p6 = scmp.lt.s32.totalorder %s1463_s28, %s1463_s28 }
  0x30   : > { %p1466_p12 = pnand %p1464_p2, %p1452_p9  ;;  %p1473_p0 = por %p1472_p6, %p1471_p3 }
  0x32   : > { %p1467_p10 = pneg %p1466_p12 }
  0x34   : > { %p1474_p7 = pnand %p1473_p0, %p1467_p10 }
  0x36   : > { %1477 = shalt.err (!%p1474_p7)
}
  0x37   : > { %s1637_s10 = smov 64   ;;  %s1638_s25 = smov 4  }
  0x38   : > { %1276 = dma.hbm_to_vmem [thread:$0]  (!%p1765_p5), %s2217_s1, 4096, %s146_s7, [#allocation6], %s1637_s10, %s1637_s10, %s1638_s25  }
  0x39   : > { %s29_s23 = sadd.s32 1, %s1626_s20  ;;  %s32_s24 = sadd.s32 1, %s1630_s21 }
  0x3a   : > { %p30_p3 = scmp.ge.s32.totalorder %s29_s23, 2  ;;  %s162_s6 = sand.u32 1, %s1614_s17  }
  0x3b   : > { %s1068_s28 = sshll.u32 %s162_s6, 8  ;;  %s1070_s8 = sshll.u32 %s1626_s20, 1 }
  0x3c   : > { %s2242_s23 = smov (%p30_p3, %s29_s23), 0  ;;  %s2244_s24 = smov (!%p30_p3, %s32_s24), %s1630_s21 }
  0x3d   : > { %2218 = sst [smem:[#allocation14_spill]] %s2242_s23  ;;  %s37_s27 = ssub.s32 %s1626_s20, %s2242_s23 }
  0x3e   : > { %p34_p6 = scmp.ge.s32.totalorder %s2244_s24, 2  ;;  %s1135_s4 = sshll.u32 %s1630_s21, 7 }
  0x3f   : > { %s166_s11 = scalar_lea.vmem [#allocation2], %s1068_s28  ;;  %s173_s10 = sadd.s32 %s1135_s4, %s1070_s8 }
  0x40   : > { %s176_s7 = sshll.u32 %s166_s11, 4  ;;  %s2246_s24 = smov (%p34_p6, %s2244_s24), 0  ;;  %s1803_s7 = int_to_ptr.vmem [resolvable:$true] %s176_s7 }
  0x41   : > { %2219 = sst [smem:[#allocation15_spill]] %s2246_s24  ;;  %s36_s25 = ssub.s32 %s1630_s21, %s2246_s24 }
  0x42   : > { %s1072_s15 = sshll.u32 %s173_s10, 6  ;;  %s38_s1 = sor.u32 %s37_s27, %s36_s25 }
  0x43   : > { %p107_p10 = scmp.eq.s32.totalorder %s36_s25, 0  ;;  %p39_p12 = scmp.eq.s32.totalorder %s38_s1, 0 }
  0x44   : > { %s1810_s20 = scalar_lea.hbm %s2190_s0, %s1072_s15  ;;  %s2220_s28 = sadd.s32 1, %s1602_s14 }
  0x45   : > { %s1815_s11 = scalar_select %p107_p10, %s1602_s14, %s2220_s28  }
  0x46   : > { %s2221_s4 = sadd.s32 1, %s1614_s17  ;;  %s1822_s24 = scalar_lea.sflag [#allocation3], %s162_s6 }
  0x47   : > { %s1820_s8 = scalar_select %p39_p12, %s1614_s17, %s2221_s4  }
  0x48   : > { %s1478_s27 = scalar_lea.hbm %s1810_s20, 4096  ;;  %p2222_p5 = scmp.ne.s32.totalorder %s2216_s9, 0 }
  0x49   : > { %p1479_p0 = scmp.ne.s32.totalorder %s1810_s20, %s1478_s27  ;;  %s1483_s23 = scalar_lea.hbm %s2190_s0, 16384 }
  0x4a   : > { %p1480_p7 = pneg %p2222_p5  ;;  %p1484_p11 = scmp.lt.u32.totalorder %s1810_s20, %s2190_s0 }
  0x4b   : > { %p1485_p13 = scmp.lt.u32.totalorder %s1483_s23, %s1478_s27  ;;  %p1487_p4 = scmp.lt.u32.totalorder %s1478_s27, %s1810_s20 }
  0x4c   : > { %p1481_p8 = pnand %p1480_p7, %p1479_p0 }
  0x4d   : > { %p1486_p1 = por %p1485_p13, %p1484_p11 }
  0x4e   : > { %p1482_p9 = pneg %p1481_p8 }
  0x4f   : > { %p1488_p2 = por %p1487_p4, %p1486_p1 }
  0x51   : > { %p1489_p3 = pnand %p1488_p2, %p1482_p9 }
  0x53   : > { %1492 = shalt.err (!%p1489_p3)
}
  0x54   : > { %s1493_s6 = scalar_lea.vmem %s1803_s7, 4096  ;;  %s1639_s15 = smov [#allocation2]  }
  0x55   : > { %p1494_p6 = scmp.ne.s32.totalorder %s1803_s7, %s1493_s6  ;;  %s1498_s28 = sshll.u32 %s1639_s15, 4  ;;  %s1499_s28 = int_to_ptr.vmem [resolvable:$false] %s1498_s28 }
  0x56   : > { %s1500_s4 = scalar_lea.vmem %s1499_s28, 8192  ;;  %p1501_p0 = scmp.lt.s32.totalorder %s1803_s7, %s1499_s28 }
  0x57   : > { %p1496_p10 = pnand %p1494_p6, %p1480_p7  ;;  %p1502_p8 = scmp.lt.s32.totalorder %s1500_s4, %s1493_s6 }
  0x59   : > { %p1497_p12 = pneg %p1496_p10  ;;  %p1503_p11 = por %p1502_p8, %p1501_p0 }
  0x5b   : > { %p1504_p13 = pnand %p1503_p11, %p1497_p12 }
  0x5d   : > { %1507 = shalt.err (!%p1504_p13)
}
  0x5e   : > { %s1640_s27 = smov 256   ;;  %s1641_s1 = smov 128  }
  0x5f   : > { %s1642_s12 = smov 8   ;;  %p2223_p7 = scmp.ne.s32.totalorder %s2214_s5, 0 }
  0x60   : > { %1280 = dma.hbm_to_vmem [thread:$0]  (!%p2222_p5), %s1810_s20, 4096, %s1803_s7, %s1822_s24, %s1640_s27, %s1641_s1, %s1642_s12  }
  0x61   : > { %188 = sbr.rel (%p2223_p7) target bundleno = 477 (0x1dd), region = 32  ;;  %s190_s23 = sand.u32 (!%p2223_p7), 1, %s1610_s16  }
  0x62   : > { %s1074_s10 = sshll.u32 (!%p2223_p7), %s190_s23, 8  ;;  %s191_s25 = scalar_lea.sflag (!%p2223_p7), [#allocation3], %s190_s23 }
  0x63   : > { %s1853_s6 = scalar_lea.vmem (!%p2223_p7), [#allocation2], %s1074_s10  ;;  %p2224_p9 = scmp.ne.s32.totalorder (!%p2223_p7), %s2210_s29, 0 }
  0x68   : > { %1581 = dma.done.wait (%p2224_p9), %s191_s25, 4096  }
  0x69   : > { %1583 = vsyncadd (%p2224_p9), %s191_s25, 4294963200  ;;  %p2225_p1 = scmp.ne.s32.totalorder %s2208_s26, 0 }
  0x6b   : > { %1585 = dma.done.wait (%p2225_p1), [#allocation6], 4096  }
  0x6c   : > { %1587 = vsyncadd (%p2225_p1), [#allocation6], 4294963200  ;;  %s218_s20 = sand.u32 1, %s1598_s13   ;;  %p1077_p5 = scmp.ne.s32.totalorder %s1618_s18, 0 }
  0x6d   : > { %s1076_s5 = sshll.u32 %s218_s20, 8  ;;  %v1643_v0 = vmov (!%p1077_p5), 0.0  }
  0x6e   : > { %s1866_s9 = scalar_lea.vmem [#allocation7], %s1076_s5  ;;  %228 = sbr.rel (%p1077_p5) target bundleno = 127 (0x7f), region = 44 }
  0x6f   : > { %229 = vst [vmem:[%s1866_s9] sm:$0xff] (!%p1077_p5), %v1643_v0  ;;  %230 = vst [vmem:[%s1866_s9 + $0x8] sm:$0xff] (!%p1077_p5), %v1643_v0 }
  0x70   : > { %231 = vst [vmem:[%s1866_s9 + $0x10] sm:$0xff] (!%p1077_p5), %v1643_v0  ;;  %232 = vst [vmem:[%s1866_s9 + $0x18] sm:$0xff] (!%p1077_p5), %v1643_v0 }
  0x71   : > { %233 = vst [vmem:[%s1866_s9 + $0x20] sm:$0xff] (!%p1077_p5), %v1643_v0  ;;  %234 = vst [vmem:[%s1866_s9 + $0x28] sm:$0xff] (!%p1077_p5), %v1643_v0 }
  0x72   : > { %235 = vst [vmem:[%s1866_s9 + $0x30] sm:$0xff] (!%p1077_p5), %v1643_v0  ;;  %236 = vst [vmem:[%s1866_s9 + $0x38] sm:$0xff] (!%p1077_p5), %v1643_v0 }
  0x73   : > { %237 = vst [vmem:[%s1866_s9 + $0x40] sm:$0xff] (!%p1077_p5), %v1643_v0  ;;  %238 = vst [vmem:[%s1866_s9 + $0x48] sm:$0xff] (!%p1077_p5), %v1643_v0 }
  0x74   : > { %239 = vst [vmem:[%s1866_s9 + $0x50] sm:$0xff] (!%p1077_p5), %v1643_v0  ;;  %240 = vst [vmem:[%s1866_s9 + $0x58] sm:$0xff] (!%p1077_p5), %v1643_v0 }
  0x75   : > { %241 = vst [vmem:[%s1866_s9 + $0x60] sm:$0xff] %v1643_v0  ;;  %242 = vst [vmem:[%s1866_s9 + $0x68] sm:$0xff] %v1643_v0 }
  0x76   : > { %243 = vst [vmem:[%s1866_s9 + $0x70] sm:$0xff] %v1643_v0  ;;  %244 = vst [vmem:[%s1866_s9 + $0x78] sm:$0xff] %v1643_v0 }
  0x77   : > { %245 = vst [vmem:[%s1866_s9 + $0x80] sm:$0xff] %v1643_v0  ;;  %246 = vst [vmem:[%s1866_s9 + $0x88] sm:$0xff] %v1643_v0 }
  0x78   : > { %247 = vst [vmem:[%s1866_s9 + $0x90] sm:$0xff] %v1643_v0  ;;  %248 = vst [vmem:[%s1866_s9 + $0x98] sm:$0xff] %v1643_v0 }
  0x79   : > { %249 = vst [vmem:[%s1866_s9 + $0xa0] sm:$0xff] %v1643_v0  ;;  %250 = vst [vmem:[%s1866_s9 + $0xa8] sm:$0xff] %v1643_v0 }
  0x7a   : > { %251 = vst [vmem:[%s1866_s9 + $0xb0] sm:$0xff] %v1643_v0  ;;  %252 = vst [vmem:[%s1866_s9 + $0xb8] sm:$0xff] %v1643_v0 }
  0x7b   : > { %253 = vst [vmem:[%s1866_s9 + $0xc0] sm:$0xff] %v1643_v0  ;;  %254 = vst [vmem:[%s1866_s9 + $0xc8] sm:$0xff] %v1643_v0 }
  0x7c   : > { %255 = vst [vmem:[%s1866_s9 + $0xd0] sm:$0xff] %v1643_v0  ;;  %256 = vst [vmem:[%s1866_s9 + $0xd8] sm:$0xff] %v1643_v0 }
  0x7d   : > { %257 = vst [vmem:[%s1866_s9 + $0xe0] sm:$0xff] %v1643_v0  ;;  %258 = vst [vmem:[%s1866_s9 + $0xe8] sm:$0xff] %v1643_v0 }
  0x7e   : > { %259 = vst [vmem:[%s1866_s9 + $0xf0] sm:$0xff] %v1643_v0  ;;  %260 = vst [vmem:[%s1866_s9 + $0xf8] sm:$0xff] %v1643_v0 }
  0x7f PF: > { %s1078_s26 = sshll.u32 %s1618_s18, 8  ;;  %v1404_v1 = vld [vmem:[%s1853_s6 + $0x4] ss:$8 sps:$4 sm:$0xff]   ;;  %v1402_v19 = vld [vmem:[%s1853_s6] ss:$8 sps:$4 sm:$0xff]   ;;  %p1128_p4 = scmp.ne.s32.totalorder %s1618_s18, 1 }
  0x80   : > { %s262_s29 = sshra.s32 %s1078_s26, 3  ;;  %v1407_v2 = vld [vmem:[%s1853_s6 + $0x84] ss:$8 sps:$4 sm:$0xff]   ;;  %650 = vmatprep.mubr.bf16.mxu0 %v1404_v1  ;;  %v1405_v20 = vld [vmem:[%s1853_s6 + $0x80] ss:$8 sps:$4 sm:$0xff]  }
  0x81   : > { %s1079_s24 = sshll.u32 %s262_s29, 2  ;;  %714 = vmatprep.mubr.bf16.mxu1 %v1407_v2  ;;  %v1408_v21 = vld [vmem:[%s1853_s6 + $0x14] ss:$8 sps:$4 sm:$0xff]   ;;  %v1412_v23 = vld [vmem:[%s1853_s6 + $0x10] ss:$8 sps:$4 sm:$0xff]   ;;  %v298_v51 = vld [vmem:[%s1866_s9] sm:$0xff] }
  0x82   : > { %s1904_s7 = scalar_lea.vmem [#allocation5], %s1079_s24  ;;  %v1410_v22 = vld [vmem:[%s1853_s6 + $0x94] ss:$8 sps:$4 sm:$0xff]   ;;  %v1413_v24 = vld [vmem:[%s1853_s6 + $0x90] ss:$8 sps:$4 sm:$0xff]   ;;  %v314_v53 = vld [vmem:[%s1866_s9 + $0x80] sm:$0xff] }
  0x83   : > { %v1386_v3 = vld [vmem:[%s1904_s7 + $0x40] sm:$0xff]   ;;  %v1388_v5 = vld [vmem:[%s1904_s7 + $0x48] sm:$0xff]   ;;  %v1390_v7 = vld [vmem:[%s1904_s7 + $0x50] sm:$0xff]  }
  0x84   : > { %v1387_v4 = vld [vmem:[%s1904_s7] sm:$0xff]   ;;  %1137 = vmatprep.subr.bf16.mxu0 %v1386_v3  ;;  %1249 = vmatprep.subr.bf16.mxu1 %v1386_v3  ;;  %v1389_v6 = vld [vmem:[%s1904_s7 + $0x8] sm:$0xff]   ;;  %v1391_v8 = vld [vmem:[%s1904_s7 + $0x10] sm:$0xff]  }
  0x85   : > { %1138 = vmatpush3.bf16.msra.mxu0 %v1387_v4  ;;  %1257 = vmatpush3.bf16.msra.mxu1 %v1387_v4  ;;  %v1392_v9 = vld [vmem:[%s1904_s7 + $0x58] sm:$0xff]   ;;  %v1394_v11 = vld [vmem:[%s1904_s7 + $0x60] sm:$0xff]   ;;  %v1396_v13 = vld [vmem:[%s1904_s7 + $0x68] sm:$0xff]  }
  0x86   : > { %1139 = vmatprep.subr.bf16.mxu0 %v1388_v5  ;;  %1250 = vmatprep.subr.bf16.mxu1 %v1388_v5  ;;  %v1393_v10 = vld [vmem:[%s1904_s7 + $0x18] sm:$0xff]   ;;  %v1395_v12 = vld [vmem:[%s1904_s7 + $0x20] sm:$0xff]   ;;  %v1397_v14 = vld [vmem:[%s1904_s7 + $0x28] sm:$0xff]  }
  0x87   : > { %v1398_v15 = vld [vmem:[%s1904_s7 + $0x70] sm:$0xff]   ;;  %v1400_v17 = vld [vmem:[%s1904_s7 + $0x78] sm:$0xff]   ;;  %v1414_v25 = vld [vmem:[%s1853_s6 + $0x24] ss:$8 sps:$4 sm:$0xff]  }
  0x88   : > { %v1399_v16 = vld [vmem:[%s1904_s7 + $0x30] sm:$0xff]   ;;  %v1401_v18 = vld [vmem:[%s1904_s7 + $0x38] sm:$0xff]   ;;  %v1416_v26 = vld [vmem:[%s1853_s6 + $0xa4] ss:$8 sps:$4 sm:$0xff]  }
  0x89   : > { %1140 = vmatpush3.bf16.msra.mxu0 %v1389_v6  ;;  %1258 = vmatpush3.bf16.msra.mxu1 %v1389_v6  ;;  %v1418_v27 = vld [vmem:[%s1853_s6 + $0x20] ss:$8 sps:$4 sm:$0xff]   ;;  %v1420_v29 = vld [vmem:[%s1853_s6 + $0x34] ss:$8 sps:$4 sm:$0xff]   ;;  %v1424_v31 = vld [vmem:[%s1853_s6 + $0x30] ss:$8 sps:$4 sm:$0xff]  }
  0x8a   : > { %1141 = vmatprep.subr.bf16.mxu0 %v1390_v7  ;;  %1251 = vmatprep.subr.bf16.mxu1 %v1390_v7  ;;  %v1419_v28 = vld [vmem:[%s1853_s6 + $0xa0] ss:$8 sps:$4 sm:$0xff]   ;;  %v1422_v30 = vld [vmem:[%s1853_s6 + $0xb4] ss:$8 sps:$4 sm:$0xff]   ;;  %v1425_v32 = vld [vmem:[%s1853_s6 + $0xb0] ss:$8 sps:$4 sm:$0xff]  }
  0x8b   : > { %v1426_v33 = vld [vmem:[%s1853_s6 + $0x44] ss:$8 sps:$4 sm:$0xff]   ;;  %v1430_v35 = vld [vmem:[%s1853_s6 + $0x40] ss:$8 sps:$4 sm:$0xff]   ;;  %v1432_v37 = vld [vmem:[%s1853_s6 + $0x54] ss:$8 sps:$4 sm:$0xff]  }
  0x8c   : > { %v1428_v34 = vld [vmem:[%s1853_s6 + $0xc4] ss:$8 sps:$4 sm:$0xff]   ;;  %v1431_v36 = vld [vmem:[%s1853_s6 + $0xc0] ss:$8 sps:$4 sm:$0xff]   ;;  %v1434_v38 = vld [vmem:[%s1853_s6 + $0xd4] ss:$8 sps:$4 sm:$0xff]  }
  0x8d   : > { %1142 = vmatpush3.bf16.msra.mxu0 %v1391_v8  ;;  %1259 = vmatpush3.bf16.msra.mxu1 %v1391_v8  ;;  %v1436_v39 = vld [vmem:[%s1853_s6 + $0x50] ss:$8 sps:$4 sm:$0xff]   ;;  %v1438_v41 = vld [vmem:[%s1853_s6 + $0x64] ss:$8 sps:$4 sm:$0xff]   ;;  %v1442_v43 = vld [vmem:[%s1853_s6 + $0x60] ss:$8 sps:$4 sm:$0xff]  }
  0x8e   : > { %1143 = vmatprep.subr.bf16.mxu0 %v1392_v9  ;;  %1252 = vmatprep.subr.bf16.mxu1 %v1392_v9  ;;  %v1437_v40 = vld [vmem:[%s1853_s6 + $0xd0] ss:$8 sps:$4 sm:$0xff]   ;;  %v1440_v42 = vld [vmem:[%s1853_s6 + $0xe4] ss:$8 sps:$4 sm:$0xff]   ;;  %v1443_v44 = vld [vmem:[%s1853_s6 + $0xe0] ss:$8 sps:$4 sm:$0xff]  }
  0x8f   : > { %v1444_v45 = vld [vmem:[%s1853_s6 + $0x74] ss:$8 sps:$4 sm:$0xff]   ;;  %v1448_v47 = vld [vmem:[%s1853_s6 + $0x70] ss:$8 sps:$4 sm:$0xff]   ;;  %v299_v59 = vld [vmem:[%s1866_s9 + $0x8] sm:$0xff] }
  0x90   : > { %v1446_v46 = vld [vmem:[%s1853_s6 + $0xf4] ss:$8 sps:$4 sm:$0xff]   ;;  %v1449_v48 = vld [vmem:[%s1853_s6 + $0xf0] ss:$8 sps:$4 sm:$0xff]   ;;  %v315_v61 = vld [vmem:[%s1866_s9 + $0x88] sm:$0xff] }
  0x91   : > { %1144 = vmatpush3.bf16.msra.mxu0 %v1393_v10  ;;  %1260 = vmatpush3.bf16.msra.mxu1 %v1393_v10  ;;  %v300_v7 = vld [vmem:[%s1866_s9 + $0x10] sm:$0xff] }
  0x92   : > { %1145 = vmatprep.subr.bf16.mxu0 %v1394_v11  ;;  %1253 = vmatprep.subr.bf16.mxu1 %v1394_v11  ;;  %v316_v9 = vld [vmem:[%s1866_s9 + $0x90] sm:$0xff] }
  0x95   : > { %1146 = vmatpush3.bf16.msra.mxu0 %v1395_v12  ;;  %1261 = vmatpush3.bf16.msra.mxu1 %v1395_v12 }
  0x96   : > { %1147 = vmatprep.subr.bf16.mxu0 %v1396_v13  ;;  %1254 = vmatprep.subr.bf16.mxu1 %v1396_v13 }
  0x99   : > { %1148 = vmatpush3.bf16.msra.mxu0 %v1397_v14  ;;  %1262 = vmatpush3.bf16.msra.mxu1 %v1397_v14 }
  0x9a   : > { %1149 = vmatprep.subr.bf16.mxu0 %v1398_v15  ;;  %1255 = vmatprep.subr.bf16.mxu1 %v1398_v15  ;;  %v301_v15 = vld [vmem:[%s1866_s9 + $0x18] sm:$0xff] }
  0x9d   : > { %1150 = vmatpush3.bf16.msra.mxu0 %v1399_v16  ;;  %1263 = vmatpush3.bf16.msra.mxu1 %v1399_v16 }
  0x9e   : > { %1151 = vmatprep.subr.bf16.mxu0 %v1400_v17  ;;  %1256 = vmatprep.subr.bf16.mxu1 %v1400_v17  ;;  %v317_v17 = vld [vmem:[%s1866_s9 + $0x98] sm:$0xff] }
  0xa1   : > { %1152 = vmatpush3.bf16.msra.mxu0 %v1401_v18  ;;  %1264 = vmatpush3.bf16.msra.mxu1 %v1401_v18 }
  0xa4   : > { %651 = vmatmul.mubr.bf16.vlgmr.msra.gmra.mrb[0].mxu0 %v1402_v19  ;;  %715 = vmatmul.mubr.bf16.vlgmr.msra.gmra.mrb[0].mxu1 %v1405_v20 }
  0xa5   : > { %658 = vmatprep.mubr.bf16.mxu0 %v1408_v21  ;;  %722 = vmatprep.mubr.bf16.mxu1 %v1410_v22 }
  0xac   : > { %659 = vmatmul.mubr.bf16.gmra.mrb[4].mxu0 %v1412_v23  ;;  %723 = vmatmul.mubr.bf16.gmra.mrb[4].mxu1 %v1413_v24 }
  0xad   : > { %666 = vmatprep.mubr.bf16.mxu0 %v1414_v25  ;;  %730 = vmatprep.mubr.bf16.mxu1 %v1416_v26 }
  0xb4   : > { %667 = vmatmul.mubr.bf16.gmra.mrb[8].mxu0 %v1418_v27  ;;  %731 = vmatmul.mubr.bf16.gmra.mrb[8].mxu1 %v1419_v28  ;;  %v302_v27 = vld [vmem:[%s1866_s9 + $0x20] sm:$0xff] }
  0xb5   : > { %674 = vmatprep.mubr.bf16.mxu0 %v1420_v29  ;;  %738 = vmatprep.mubr.bf16.mxu1 %v1422_v30  ;;  %v318_v29 = vld [vmem:[%s1866_s9 + $0xa0] sm:$0xff] }
  0xbc   : > { %675 = vmatmul.mubr.bf16.gmra.mrb[12].mxu0 %v1424_v31  ;;  %739 = vmatmul.mubr.bf16.gmra.mrb[12].mxu1 %v1425_v32 }
  0xbd   : > { %682 = vmatprep.mubr.bf16.mxu0 %v1426_v33  ;;  %746 = vmatprep.mubr.bf16.mxu1 %v1428_v34 }
  0xc4   : > { %683 = vmatmul.mubr.bf16.gmra.mrb[16].mxu0 %v1430_v35  ;;  %747 = vmatmul.mubr.bf16.gmra.mrb[16].mxu1 %v1431_v36  ;;  %v303_v35 = vld [vmem:[%s1866_s9 + $0x28] sm:$0xff] }
  0xc5   : > { %690 = vmatprep.mubr.bf16.mxu0 %v1432_v37  ;;  %754 = vmatprep.mubr.bf16.mxu1 %v1434_v38  ;;  %v319_v37 = vld [vmem:[%s1866_s9 + $0xa8] sm:$0xff] }
  0xcc   : > { %691 = vmatmul.mubr.bf16.gmra.mrb[20].mxu0 %v1436_v39  ;;  %755 = vmatmul.mubr.bf16.gmra.mrb[20].mxu1 %v1437_v40 }
  0xcd   : > { %698 = vmatprep.mubr.bf16.mxu0 %v1438_v41  ;;  %762 = vmatprep.mubr.bf16.mxu1 %v1440_v42 }
  0xd4   : > { %699 = vmatmul.mubr.bf16.gmra.mrb[24].mxu0 %v1442_v43  ;;  %763 = vmatmul.mubr.bf16.gmra.mrb[24].mxu1 %v1443_v44 }
  0xd5   : > { %706 = vmatprep.mubr.bf16.mxu0 %v1444_v45  ;;  %770 = vmatprep.mubr.bf16.mxu1 %v1446_v46 }
  0xdc   : > { %707 = vmatmul.mubr.bf16.gmra.mrb[28].mxu0 %v1448_v47  ;;  %771 = vmatmul.mubr.bf16.gmra.mrb[28].mxu1 %v1449_v48  ;;  %v304_v47 = vld [vmem:[%s1866_s9 + $0x30] sm:$0xff] }
 0x177   : > { %v1153_v49 = vpop.f32.mrb[0].mxu0  ;;  %v1201_v50 = vpop.f32.mrb[0].mxu1 }
 0x178   : > { %v1154_v52 = vpop.f32.mrb[1].mxu0  ;;  %v1202_v54 = vpop.f32.mrb[1].mxu1 }
 0x179   : > { %v1155_v55 = vadd.f32 %v1154_v52, %v1153_v49  ;;  %v1203_v56 = vadd.f32 %v1202_v54, %v1201_v50  ;;  %v1156_v57 = vpop.f32.mrb[2].mxu0  ;;  %v1204_v58 = vpop.f32.mrb[2].mxu1  ;;  %v320_v49 = vld [vmem:[%s1866_s9 + $0xb0] sm:$0xff] }
 0x17a   : > { %v1157_v60 = vpop.f32.mrb[3].mxu0  ;;  %v1205_v62 = vpop.f32.mrb[3].mxu1 }
 0x17b   : > { %v779_v63 = vadd.f32 %v1155_v55, %v298_v51  ;;  %v795_v0 = vadd.f32 %v1203_v56, %v314_v53  ;;  %v1158_v1 = vadd.f32 %v1157_v60, %v1156_v57  ;;  %v1206_v2 = vadd.f32 %v1205_v62, %v1204_v58  ;;  %v305_v55 = vld [vmem:[%s1866_s9 + $0x38] sm:$0xff] }
 0x17c   : > { %v321_v57 = vld [vmem:[%s1866_s9 + $0xb8] sm:$0xff] }
 0x17d   : > { %811 = vst [vmem:[%s1866_s9] sm:$0xff] %v779_v63  ;;  %827 = vst [vmem:[%s1866_s9 + $0x80] sm:$0xff] %v795_v0  ;;  %v780_v3 = vadd.f32 %v1158_v1, %v299_v59  ;;  %v796_v4 = vadd.f32 %v1206_v2, %v315_v61 }
 0x17f   : > { %812 = vst [vmem:[%s1866_s9 + $0x8] sm:$0xff] %v780_v3  ;;  %828 = vst [vmem:[%s1866_s9 + $0x88] sm:$0xff] %v796_v4  ;;  %v1159_v5 = vpop.f32.mrb[4].mxu0  ;;  %v1207_v6 = vpop.f32.mrb[4].mxu1  ;;  %v306_v3 = vld [vmem:[%s1866_s9 + $0x40] sm:$0xff] }
 0x180   : > { %v1160_v8 = vpop.f32.mrb[5].mxu0  ;;  %v1208_v10 = vpop.f32.mrb[5].mxu1 }
 0x181   : > { %v1161_v11 = vadd.f32 %v1160_v8, %v1159_v5  ;;  %v1209_v12 = vadd.f32 %v1208_v10, %v1207_v6  ;;  %v1162_v13 = vpop.f32.mrb[6].mxu0  ;;  %v1210_v14 = vpop.f32.mrb[6].mxu1  ;;  %v322_v5 = vld [vmem:[%s1866_s9 + $0xc0] sm:$0xff] }
 0x182   : > { %v1163_v16 = vpop.f32.mrb[7].mxu0  ;;  %v1211_v18 = vpop.f32.mrb[7].mxu1 }
 0x183   : > { %v781_v19 = vadd.f32 %v1161_v11, %v300_v7  ;;  %v797_v20 = vadd.f32 %v1209_v12, %v316_v9  ;;  %v1164_v21 = vadd.f32 %v1163_v16, %v1162_v13  ;;  %v1212_v22 = vadd.f32 %v1211_v18, %v1210_v14  ;;  %v307_v11 = vld [vmem:[%s1866_s9 + $0x48] sm:$0xff] }
 0x184   : > { %v323_v13 = vld [vmem:[%s1866_s9 + $0xc8] sm:$0xff] }
 0x185   : > { %813 = vst [vmem:[%s1866_s9 + $0x10] sm:$0xff] %v781_v19  ;;  %829 = vst [vmem:[%s1866_s9 + $0x90] sm:$0xff] %v797_v20  ;;  %v782_v23 = vadd.f32 %v1164_v21, %v301_v15  ;;  %v798_v24 = vadd.f32 %v1212_v22, %v317_v17 }
 0x187   : > { %814 = vst [vmem:[%s1866_s9 + $0x18] sm:$0xff] %v782_v23  ;;  %830 = vst [vmem:[%s1866_s9 + $0x98] sm:$0xff] %v798_v24  ;;  %v1165_v25 = vpop.f32.mrb[8].mxu0  ;;  %v1213_v26 = vpop.f32.mrb[8].mxu1  ;;  %v308_v23 = vld [vmem:[%s1866_s9 + $0x50] sm:$0xff] }
 0x188   : > { %v1166_v28 = vpop.f32.mrb[9].mxu0  ;;  %v1214_v30 = vpop.f32.mrb[9].mxu1 }
 0x189   : > { %v1167_v31 = vadd.f32 %v1166_v28, %v1165_v25  ;;  %v1215_v32 = vadd.f32 %v1214_v30, %v1213_v26  ;;  %v1168_v33 = vpop.f32.mrb[10].mxu0  ;;  %v1216_v34 = vpop.f32.mrb[10].mxu1  ;;  %v324_v25 = vld [vmem:[%s1866_s9 + $0xd0] sm:$0xff] }
 0x18a   : > { %v1169_v36 = vpop.f32.mrb[11].mxu0  ;;  %v1217_v38 = vpop.f32.mrb[11].mxu1 }
 0x18b   : > { %v783_v39 = vadd.f32 %v1167_v31, %v302_v27  ;;  %v799_v40 = vadd.f32 %v1215_v32, %v318_v29  ;;  %v1170_v41 = vadd.f32 %v1169_v36, %v1168_v33  ;;  %v1218_v42 = vadd.f32 %v1217_v38, %v1216_v34  ;;  %v309_v31 = vld [vmem:[%s1866_s9 + $0x58] sm:$0xff] }
 0x18c   : > { %v325_v33 = vld [vmem:[%s1866_s9 + $0xd8] sm:$0xff] }
 0x18d   : > { %815 = vst [vmem:[%s1866_s9 + $0x20] sm:$0xff] %v783_v39  ;;  %831 = vst [vmem:[%s1866_s9 + $0xa0] sm:$0xff] %v799_v40  ;;  %v784_v43 = vadd.f32 %v1170_v41, %v303_v35  ;;  %v800_v44 = vadd.f32 %v1218_v42, %v319_v37 }
 0x18f   : > { %816 = vst [vmem:[%s1866_s9 + $0x28] sm:$0xff] %v784_v43  ;;  %832 = vst [vmem:[%s1866_s9 + $0xa8] sm:$0xff] %v800_v44  ;;  %v1171_v45 = vpop.f32.mrb[12].mxu0  ;;  %v1219_v46 = vpop.f32.mrb[12].mxu1  ;;  %v310_v43 = vld [vmem:[%s1866_s9 + $0x60] sm:$0xff] }
 0x190   : > { %v1172_v48 = vpop.f32.mrb[13].mxu0  ;;  %v1220_v50 = vpop.f32.mrb[13].mxu1 }
 0x191   : > { %v1173_v51 = vadd.f32 %v1172_v48, %v1171_v45  ;;  %v1221_v52 = vadd.f32 %v1220_v50, %v1219_v46  ;;  %v1174_v53 = vpop.f32.mrb[14].mxu0  ;;  %v1222_v54 = vpop.f32.mrb[14].mxu1  ;;  %v326_v45 = vld [vmem:[%s1866_s9 + $0xe0] sm:$0xff] }
 0x192   : > { %v1175_v56 = vpop.f32.mrb[15].mxu0  ;;  %v1223_v58 = vpop.f32.mrb[15].mxu1 }
 0x193   : > { %v785_v59 = vadd.f32 %v1173_v51, %v304_v47  ;;  %v801_v60 = vadd.f32 %v1221_v52, %v320_v49  ;;  %v1176_v61 = vadd.f32 %v1175_v56, %v1174_v53  ;;  %v1224_v62 = vadd.f32 %v1223_v58, %v1222_v54  ;;  %v311_v51 = vld [vmem:[%s1866_s9 + $0x68] sm:$0xff] }
 0x194   : > { %v327_v53 = vld [vmem:[%s1866_s9 + $0xe8] sm:$0xff] }
 0x195   : > { %817 = vst [vmem:[%s1866_s9 + $0x30] sm:$0xff] %v785_v59  ;;  %833 = vst [vmem:[%s1866_s9 + $0xb0] sm:$0xff] %v801_v60  ;;  %v786_v63 = vadd.f32 %v1176_v61, %v305_v55  ;;  %v802_v0 = vadd.f32 %v1224_v62, %v321_v57 }
 0x197   : > { %818 = vst [vmem:[%s1866_s9 + $0x38] sm:$0xff] %v786_v63  ;;  %834 = vst [vmem:[%s1866_s9 + $0xb8] sm:$0xff] %v802_v0  ;;  %v1177_v1 = vpop.f32.mrb[16].mxu0  ;;  %v1225_v2 = vpop.f32.mrb[16].mxu1  ;;  %v312_v63 = vld [vmem:[%s1866_s9 + $0x70] sm:$0xff] }
 0x198   : > { %v1178_v4 = vpop.f32.mrb[17].mxu0  ;;  %v1226_v6 = vpop.f32.mrb[17].mxu1 }
 0x199   : > { %v1179_v7 = vadd.f32 %v1178_v4, %v1177_v1  ;;  %v1227_v8 = vadd.f32 %v1226_v6, %v1225_v2  ;;  %v1180_v9 = vpop.f32.mrb[18].mxu0  ;;  %v1228_v10 = vpop.f32.mrb[18].mxu1  ;;  %v328_v1 = vld [vmem:[%s1866_s9 + $0xf0] sm:$0xff] }
 0x19a   : > { %v1181_v12 = vpop.f32.mrb[19].mxu0  ;;  %v1229_v14 = vpop.f32.mrb[19].mxu1 }
 0x19b   : > { %v787_v15 = vadd.f32 %v1179_v7, %v306_v3  ;;  %v803_v16 = vadd.f32 %v1227_v8, %v322_v5  ;;  %v1182_v17 = vadd.f32 %v1181_v12, %v1180_v9  ;;  %v1230_v18 = vadd.f32 %v1229_v14, %v1228_v10  ;;  %v313_v7 = vld [vmem:[%s1866_s9 + $0x78] sm:$0xff] }
 0x19c   : > { %v329_v9 = vld [vmem:[%s1866_s9 + $0xf8] sm:$0xff] }
 0x19d   : > { %819 = vst [vmem:[%s1866_s9 + $0x40] sm:$0xff] %v787_v15  ;;  %835 = vst [vmem:[%s1866_s9 + $0xc0] sm:$0xff] %v803_v16  ;;  %v788_v19 = vadd.f32 %v1182_v17, %v307_v11  ;;  %v804_v20 = vadd.f32 %v1230_v18, %v323_v13  ;;  %v847_v17 = vld [vmem:[%s1866_s9] sm:$0xff] (!%p1128_p4) }
 0x19e   : > { %v2021_v18 = vld [vmem:[%s2192_s2] ss:$0 sm:$0xff] (!%p1128_p4) }
 0x19f   : > { %820 = vst [vmem:[%s1866_s9 + $0x48] sm:$0xff] %v788_v19  ;;  %836 = vst [vmem:[%s1866_s9 + $0xc8] sm:$0xff] %v804_v20  ;;  %v1183_v21 = vpop.f32.mrb[20].mxu0  ;;  %v1231_v22 = vpop.f32.mrb[20].mxu1  ;;  %v848_v19 = vld [vmem:[%s1866_s9 + $0x8] sm:$0xff] (!%p1128_p4)  ;;  %v886_v20 = vadd.f32 (!%p1128_p4), %v2021_v18, %v847_v17 }
 0x1a0   : > { %v1184_v24 = vpop.f32.mrb[21].mxu0  ;;  %v1232_v26 = vpop.f32.mrb[21].mxu1 }
 0x1a1   : > { %v1185_v27 = vadd.f32 %v1184_v24, %v1183_v21  ;;  %v1233_v28 = vadd.f32 %v1232_v26, %v1231_v22  ;;  %v1186_v29 = vpop.f32.mrb[22].mxu0  ;;  %v1234_v30 = vpop.f32.mrb[22].mxu1  ;;  %v887_v21 = vadd.f32 (!%p1128_p4), %v2021_v18, %v848_v19  ;;  %v849_v22 = vld [vmem:[%s1866_s9 + $0x10] sm:$0xff] (!%p1128_p4)  ;;  %v851_v24 = vld [vmem:[%s1866_s9 + $0x20] sm:$0xff] (!%p1128_p4)  ;;  %918 = vst [vmem:[%s1866_s9] sm:$0xff] (!%p1128_p4), %v886_v20 }
 0x1a2   : > { %v1187_v32 = vpop.f32.mrb[23].mxu0  ;;  %v1235_v34 = vpop.f32.mrb[23].mxu1 }
 0x1a3   : > { %v789_v35 = vadd.f32 %v1185_v27, %v308_v23  ;;  %v805_v36 = vadd.f32 %v1233_v28, %v324_v25  ;;  %v1188_v37 = vadd.f32 %v1187_v32, %v1186_v29  ;;  %v1236_v38 = vadd.f32 %v1235_v34, %v1234_v30  ;;  %v850_v23 = vld [vmem:[%s1866_s9 + $0x18] sm:$0xff] (!%p1128_p4)  ;;  %v852_v28 = vld [vmem:[%s1866_s9 + $0x28] sm:$0xff] (!%p1128_p4)  ;;  %v853_v29 = vld [vmem:[%s1866_s9 + $0x30] sm:$0xff] (!%p1128_p4)  ;;  %919 = vst [vmem:[%s1866_s9 + $0x8] sm:$0xff] (!%p1128_p4), %v887_v21 }
 0x1a4   : > { %v888_v25 = vadd.f32 (!%p1128_p4), %v2021_v18, %v849_v22  ;;  %v889_v26 = vadd.f32 (!%p1128_p4), %v2021_v18, %v850_v23  ;;  %v890_v27 = vadd.f32 (!%p1128_p4), %v2021_v18, %v851_v24  ;;  %v854_v30 = vld [vmem:[%s1866_s9 + $0x38] sm:$0xff] (!%p1128_p4)  ;;  %v892_v32 = vadd.f32 (!%p1128_p4), %v2021_v18, %v853_v29  ;;  %v855_v34 = vld [vmem:[%s1866_s9 + $0x40] sm:$0xff] (!%p1128_p4) }
 0x1a5   : > { %821 = vst [vmem:[%s1866_s9 + $0x50] sm:$0xff] %v789_v35  ;;  %837 = vst [vmem:[%s1866_s9 + $0xd0] sm:$0xff] %v805_v36  ;;  %v790_v39 = vadd.f32 %v1188_v37, %v309_v31  ;;  %v806_v40 = vadd.f32 %v1236_v38, %v325_v33  ;;  %v891_v31 = vadd.f32 (!%p1128_p4), %v2021_v18, %v852_v28 }
 0x1a6   : > { %v893_v33 = vadd.f32 (!%p1128_p4), %v2021_v18, %v854_v30  ;;  %v856_v35 = vld [vmem:[%s1866_s9 + $0x48] sm:$0xff] (!%p1128_p4)  ;;  %920 = vst [vmem:[%s1866_s9 + $0x10] sm:$0xff] (!%p1128_p4), %v888_v25  ;;  %921 = vst [vmem:[%s1866_s9 + $0x18] sm:$0xff] (!%p1128_p4), %v889_v26  ;;  %v894_v37 = vadd.f32 (!%p1128_p4), %v2021_v18, %v855_v34 }
 0x1a7   : > { %822 = vst [vmem:[%s1866_s9 + $0x58] sm:$0xff] %v790_v39  ;;  %838 = vst [vmem:[%s1866_s9 + $0xd8] sm:$0xff] %v806_v40  ;;  %v1189_v41 = vpop.f32.mrb[24].mxu0  ;;  %v1237_v42 = vpop.f32.mrb[24].mxu1  ;;  %v895_v38 = vadd.f32 (!%p1128_p4), %v2021_v18, %v856_v35 }
 0x1a8   : > { %v1190_v44 = vpop.f32.mrb[25].mxu0  ;;  %v1238_v46 = vpop.f32.mrb[25].mxu1  ;;  %922 = vst [vmem:[%s1866_s9 + $0x20] sm:$0xff] (!%p1128_p4), %v890_v27  ;;  %923 = vst [vmem:[%s1866_s9 + $0x28] sm:$0xff] (!%p1128_p4), %v891_v31 }
 0x1a9   : > { %v1191_v47 = vadd.f32 %v1190_v44, %v1189_v41  ;;  %v1239_v48 = vadd.f32 %v1238_v46, %v1237_v42  ;;  %v1192_v49 = vpop.f32.mrb[26].mxu0  ;;  %v1240_v50 = vpop.f32.mrb[26].mxu1  ;;  %924 = vst [vmem:[%s1866_s9 + $0x30] sm:$0xff] (!%p1128_p4), %v892_v32  ;;  %925 = vst [vmem:[%s1866_s9 + $0x38] sm:$0xff] (!%p1128_p4), %v893_v33 }
 0x1aa   : > { %v1193_v52 = vpop.f32.mrb[27].mxu0  ;;  %v1241_v54 = vpop.f32.mrb[27].mxu1  ;;  %926 = vst [vmem:[%s1866_s9 + $0x40] sm:$0xff] (!%p1128_p4), %v894_v37  ;;  %927 = vst [vmem:[%s1866_s9 + $0x48] sm:$0xff] (!%p1128_p4), %v895_v38 }
 0x1ab   : > { %v791_v55 = vadd.f32 %v1191_v47, %v310_v43  ;;  %v807_v56 = vadd.f32 %v1239_v48, %v326_v45  ;;  %v1194_v57 = vadd.f32 %v1193_v52, %v1192_v49  ;;  %v1242_v58 = vadd.f32 %v1241_v54, %v1240_v50  ;;  %v863_v48 = vld [vmem:[%s1866_s9 + $0x80] sm:$0xff] (!%p1128_p4)  ;;  %v864_v52 = vld [vmem:[%s1866_s9 + $0x88] sm:$0xff] (!%p1128_p4)  ;;  %v866_v54 = vld [vmem:[%s1866_s9 + $0x98] sm:$0xff] (!%p1128_p4) }
 0x1ac   : > { %v857_v36 = vld [vmem:[%s1866_s9 + $0x50] sm:$0xff] (!%p1128_p4) }
 0x1ad   : > { %823 = vst [vmem:[%s1866_s9 + $0x60] sm:$0xff] %v791_v55  ;;  %839 = vst [vmem:[%s1866_s9 + $0xe0] sm:$0xff] %v807_v56  ;;  %v792_v59 = vadd.f32 %v1194_v57, %v311_v51  ;;  %v808_v60 = vadd.f32 %v1242_v58, %v327_v53  ;;  %v896_v39 = vadd.f32 (!%p1128_p4), %v2021_v18, %v857_v36  ;;  %v865_v53 = vld [vmem:[%s1866_s9 + $0x90] sm:$0xff] (!%p1128_p4)  ;;  %v867_v58 = vld [vmem:[%s1866_s9 + $0xa0] sm:$0xff] (!%p1128_p4) }
 0x1ae   : > { %v858_v40 = vld [vmem:[%s1866_s9 + $0x58] sm:$0xff] (!%p1128_p4)  ;;  %v902_v51 = vadd.f32 (!%p1128_p4), %v2021_v18, %v863_v48  ;;  %v903_v55 = vadd.f32 (!%p1128_p4), %v2021_v18, %v864_v52  ;;  %v904_v56 = vadd.f32 (!%p1128_p4), %v2021_v18, %v865_v53  ;;  %v905_v57 = vadd.f32 (!%p1128_p4), %v2021_v18, %v866_v54 }
 0x1af   : > { %824 = vst [vmem:[%s1866_s9 + $0x68] sm:$0xff] %v792_v59  ;;  %840 = vst [vmem:[%s1866_s9 + $0xe8] sm:$0xff] %v808_v60  ;;  %v1195_v61 = vpop.f32.mrb[28].mxu0  ;;  %v1243_v62 = vpop.f32.mrb[28].mxu1  ;;  %v897_v43 = vadd.f32 (!%p1128_p4), %v2021_v18, %v858_v40  ;;  %v868_v59 = vld [vmem:[%s1866_s9 + $0xa8] sm:$0xff] (!%p1128_p4)  ;;  %v869_v60 = vld [vmem:[%s1866_s9 + $0xb0] sm:$0xff] (!%p1128_p4) }
 0x1b0   : > { %v1196_v0 = vpop.f32.mrb[29].mxu0  ;;  %v1244_v2 = vpop.f32.mrb[29].mxu1  ;;  %928 = vst [vmem:[%s1866_s9 + $0x50] sm:$0xff] (!%p1128_p4), %v896_v39  ;;  %934 = vst [vmem:[%s1866_s9 + $0x80] sm:$0xff] (!%p1128_p4), %v902_v51 }
 0x1b1   : > { %v1197_v3 = vadd.f32 %v1196_v0, %v1195_v61  ;;  %v1245_v4 = vadd.f32 %v1244_v2, %v1243_v62  ;;  %v1198_v5 = vpop.f32.mrb[30].mxu0  ;;  %v1246_v6 = vpop.f32.mrb[30].mxu1  ;;  %846 = sbr.rel (%p1128_p4) target bundleno = 451 (0x1c3), region = 48  ;;  %929 = vst [vmem:[%s1866_s9 + $0x58] sm:$0xff] (!%p1128_p4), %v897_v43  ;;  %v906_v61 = vadd.f32 (!%p1128_p4), %v2021_v18, %v867_v58  ;;  %v907_v62 = vadd.f32 (!%p1128_p4), %v2021_v18, %v868_v59  ;;  %v870_v0 = vld [vmem:[%s1866_s9 + $0xb8] sm:$0xff] (!%p1128_p4)  ;;  %v872_v2 = vld [vmem:[%s1866_s9 + $0xc8] sm:$0xff] (!%p1128_p4) }
 0x1b2   : > { %v1199_v8 = vpop.f32.mrb[31].mxu0  ;;  %v1247_v10 = vpop.f32.mrb[31].mxu1  ;;  %935 = vst [vmem:[%s1866_s9 + $0x88] sm:$0xff] (!%p1128_p4), %v903_v55  ;;  %936 = vst [vmem:[%s1866_s9 + $0x90] sm:$0xff] (!%p1128_p4), %v904_v56 }
 0x1b3   : > { %v793_v11 = vadd.f32 %v1197_v3, %v312_v63  ;;  %v809_v12 = vadd.f32 %v1245_v4, %v328_v1  ;;  %v1200_v13 = vadd.f32 %v1199_v8, %v1198_v5  ;;  %v1248_v14 = vadd.f32 %v1247_v10, %v1246_v6  ;;  %v871_v1 = vld [vmem:[%s1866_s9 + $0xc0] sm:$0xff] (!%p1128_p4)  ;;  %937 = vst [vmem:[%s1866_s9 + $0x98] sm:$0xff] (!%p1128_p4), %v905_v57  ;;  %v873_v6 = vld [vmem:[%s1866_s9 + $0xd0] sm:$0xff] (!%p1128_p4) }
 0x1b4   : > { %v859_v41 = vld [vmem:[%s1866_s9 + $0x60] sm:$0xff] (!%p1128_p4)  ;;  %v908_v63 = vadd.f32 (!%p1128_p4), %v2021_v18, %v869_v60  ;;  %v909_v3 = vadd.f32 (!%p1128_p4), %v2021_v18, %v870_v0  ;;  %v910_v4 = vadd.f32 (!%p1128_p4), %v2021_v18, %v871_v1  ;;  %v911_v5 = vadd.f32 (!%p1128_p4), %v2021_v18, %v872_v2  ;;  %938 = vst [vmem:[%s1866_s9 + $0xa0] sm:$0xff] (!%p1128_p4), %v906_v61 }
 0x1b5   : > { %825 = vst [vmem:[%s1866_s9 + $0x70] sm:$0xff] %v793_v11  ;;  %841 = vst [vmem:[%s1866_s9 + $0xf0] sm:$0xff] %v809_v12  ;;  %v794_v15 = vadd.f32 %v1200_v13, %v313_v7  ;;  %v810_v16 = vadd.f32 %v1248_v14, %v329_v9  ;;  %v898_v44 = vadd.f32 (!%p1128_p4), %v2021_v18, %v859_v41  ;;  %v874_v7 = vld [vmem:[%s1866_s9 + $0xd8] sm:$0xff] (!%p1128_p4)  ;;  %v875_v8 = vld [vmem:[%s1866_s9 + $0xe0] sm:$0xff] (!%p1128_p4) }
 0x1b6   : > { %v860_v42 = vld [vmem:[%s1866_s9 + $0x68] sm:$0xff] (!%p1128_p4)  ;;  %939 = vst [vmem:[%s1866_s9 + $0xa8] sm:$0xff] (!%p1128_p4), %v907_v62  ;;  %940 = vst [vmem:[%s1866_s9 + $0xb0] sm:$0xff] (!%p1128_p4), %v908_v63  ;;  %v912_v9 = vadd.f32 (!%p1128_p4), %v2021_v18, %v873_v6  ;;  %v913_v10 = vadd.f32 (!%p1128_p4), %v2021_v18, %v874_v7  ;;  %v914_v11 = vadd.f32 (!%p1128_p4), %v2021_v18, %v875_v8 }
 0x1b7   : > { %826 = vst [vmem:[%s1866_s9 + $0x78] sm:$0xff] %v794_v15  ;;  %842 = vst [vmem:[%s1866_s9 + $0xf8] sm:$0xff] %v810_v16  ;;  %v899_v45 = vadd.f32 (!%p1128_p4), %v2021_v18, %v860_v42  ;;  %v876_v12 = vld [vmem:[%s1866_s9 + $0xe8] sm:$0xff] (!%p1128_p4) }
 0x1b8   : > { %930 = vst [vmem:[%s1866_s9 + $0x60] sm:$0xff] %v898_v44  ;;  %941 = vst [vmem:[%s1866_s9 + $0xb8] sm:$0xff] %v909_v3  ;;  %v915_v15 = vadd.f32 %v2021_v18, %v876_v12 }
 0x1b9   : > { %931 = vst [vmem:[%s1866_s9 + $0x68] sm:$0xff] %v899_v45  ;;  %942 = vst [vmem:[%s1866_s9 + $0xc0] sm:$0xff] %v910_v4 }
 0x1ba   : > { %943 = vst [vmem:[%s1866_s9 + $0xc8] sm:$0xff] %v911_v5  ;;  %944 = vst [vmem:[%s1866_s9 + $0xd0] sm:$0xff] %v912_v9 }
 0x1bb   : > { %945 = vst [vmem:[%s1866_s9 + $0xd8] sm:$0xff] %v913_v10  ;;  %946 = vst [vmem:[%s1866_s9 + $0xe0] sm:$0xff] %v914_v11 }
 0x1bc   : > { %v861_v46 = vld [vmem:[%s1866_s9 + $0x70] sm:$0xff]  ;;  %947 = vst [vmem:[%s1866_s9 + $0xe8] sm:$0xff] %v915_v15 }
 0x1bd   : > { %v900_v49 = vadd.f32 %v2021_v18, %v861_v46  ;;  %v877_v13 = vld [vmem:[%s1866_s9 + $0xf0] sm:$0xff] }
 0x1be   : > { %v862_v47 = vld [vmem:[%s1866_s9 + $0x78] sm:$0xff]  ;;  %v916_v16 = vadd.f32 %v2021_v18, %v877_v13 }
 0x1bf   : > { %v901_v50 = vadd.f32 %v2021_v18, %v862_v47  ;;  %932 = vst [vmem:[%s1866_s9 + $0x70] sm:$0xff] %v900_v49  ;;  %v878_v14 = vld [vmem:[%s1866_s9 + $0xf8] sm:$0xff] }
 0x1c0   : > { %v917_v17 = vadd.f32 %v2021_v18, %v878_v14  ;;  %948 = vst [vmem:[%s1866_s9 + $0xf0] sm:$0xff] %v916_v16 }
 0x1c1   : > { %933 = vst [vmem:[%s1866_s9 + $0x78] sm:$0xff] %v901_v50 }
 0x1c2   : > { %949 = vst [vmem:[%s1866_s9 + $0xf8] sm:$0xff] %v917_v17 }
 0x1c3 PF: > { %s1136_s18 = sshll.u32 %s1622_s19, 12  ;;  %s964_s12 = sshll.u32 %s1866_s9, 4  ;;  %s2125_s12 = int_to_ptr.vmem [resolvable:$true] %s964_s12 }
 0x1c4   : > { %s2122_s1 = scalar_lea.hbm %s2193_s3, %s1136_s18  ;;  %s2129_s23 = scalar_lea.sflag [#allocation4], %s218_s20 }
 0x1c5   : > { %s1508_s10 = scalar_lea.vmem %s2125_s12, 4096  ;;  %p2226_p3 = scmp.ne.s32.totalorder %s2211_s30, 0 }
 0x1c6   : > { %p1509_p2 = scmp.ne.s32.totalorder %s2125_s12, %s1508_s10  ;;  %s1644_s19 = smov [#allocation7]  }
 0x1c7   : > { %s1512_s25 = sshll.u32 %s1644_s19, 4  ;;  %s1513_s25 = int_to_ptr.vmem [resolvable:$false] %s1512_s25 }
 0x1c8   : > { %p1510_p6 = pnand %p1509_p2, %p2226_p3  ;;  %s1514_s6 = scalar_lea.vmem %s1513_s25, 8192 }
 0x1c9   : > { %p1515_p12 = scmp.lt.s32.totalorder %s2125_s12, %s1513_s25  ;;  %p1516_p0 = scmp.lt.s32.totalorder %s1514_s6, %s1508_s10 }
 0x1ca   : > { %p1511_p10 = pneg %p1510_p6 }
 0x1cb   : > { %p1517_p8 = por %p1516_p0, %p1515_p12 }
 0x1cd   : > { %p1518_p11 = pnand %p1517_p8, %p1511_p10 }
 0x1cf   : > { %1521 = shalt.err (!%p1518_p11)
}
 0x1d0   : > { %s1522_s20 = scalar_lea.hbm %s2122_s1, 4096  ;;  %s1526_s26 = scalar_lea.hbm %s2193_s3, 8192 }
 0x1d1   : > { %p1523_p13 = scmp.ne.s32.totalorder %s2122_s1, %s1522_s20  ;;  %p1527_p1 = scmp.lt.u32.totalorder %s2122_s1, %s2193_s3 }
 0x1d2   : > { %p1528_p5 = scmp.lt.u32.totalorder %s1526_s26, %s1522_s20  ;;  %p1530_p2 = scmp.lt.u32.totalorder %s1522_s20, %s2122_s1 }
 0x1d3   : > { %p1524_p7 = pnand %p1523_p13, %p2226_p3 }
 0x1d4   : > { %p1529_p4 = por %p1528_p5, %p1527_p1 }
 0x1d5   : > { %p1525_p9 = pneg %p1524_p7 }
 0x1d6   : > { %p1531_p6 = por %p1530_p2, %p1529_p4 }
 0x1d8   : > { %p1532_p10 = pnand %p1531_p6, %p1525_p9 }
 0x1da   : > { %1535 = shalt.err (!%p1532_p10)
}
 0x1db   : > { %s1645_s7 = smov 128   ;;  %s1646_s15 = smov 8  }
 0x1dc   : > { %1271 = dma.vmem_to_hbm [thread:$0]  (%p2226_p3), %s2125_s12, 4096, %s2122_s1, %s2129_s23, %s1645_s7, %s1645_s7, %s1646_s15  }
 0x1dd PF: > { %s2227_s28 = sld [smem:[#allocation11_spill]]  ;;  %s2228_s18 = sld [smem:[#allocation13_spill]] }
 0x1de   : > { %p1288_p12 = scmp.ge.s32.totalorder %s1634_s22, 2 }
 0x1e3   : > { %s979_s4 = sand.u32 1, %s2227_s28   ;;  %p2229_p0 = scmp.ne.s32.totalorder %s2228_s18, 0 }
 0x1e4   : > { %s980_s27 = scalar_lea.sflag [#allocation4], %s979_s4 }
 0x1e5   : > { %p1282_p8 = pnand %p1288_p12, %p2229_p0 }
 0x1e7   : > { %1589 = dma.done.wait (!%p1282_p8), %s980_s27, 4096  }
 0x1e8   : > { %1591 = vsyncadd (!%p1282_p8), %s980_s27, 4294963200  ;;  %s20_s22 = sadd.s32 1, %s1634_s22   ;;  %s2230_s18 = sld [smem:[#allocation12_spill]] }
 0x1e9   : > { %p17_p11 = scmp.ge.s32.totalorder %s20_s22, 6   ;;  %s2231_s20 = sld [smem:[#allocation14_spill]] }
 0x1ea   : > { %s2232_s30 = sld [smem:[#allocation15_spill]]  ;;  %s2233_s12 = smov %s1598_s13 }
 0x1eb   : > { %s2234_s13 = smov %s1602_s14  ;;  %s2235_s14 = smov %s1815_s11 }
 0x1ec   : > { %s2236_s15 = smov %s1610_s16  ;;  %s2237_s16 = smov %s1614_s17 }
 0x1ed   : > { %s2238_s17 = smov %s1820_s8  ;;  %s2239_s19 = smov %s1630_s21 }
 0x1ee   :  { %19 = sbr.rel (!%p17_p11) target bundleno = 12 (0xc), region = 90 }
 0x1f0   : > { %s2240_s21 = smov %s2232_s30 }
 0x1f5   :  { %985 = vsyncpa [#allocation3], 1 }
 0x1f6   :  { %987 = vsyncpa [#allocation3 + $0x1], 1 }
 0x1f7   :  { %988 = vsyncpa [#allocation6], 1 }
 0x1f8   :  { %989 = vsyncpa [#allocation4], 1 }
 0x1f9   :  { %991 = vsyncpa [#allocation4 + $0x1], 1 }

</bundles_post_ra>
